<compile_context>
chip_gen: v6e
topology: v6e:2x2x1
jax: 0.10.0
libtpu: 0.0.40
codegen_flags: <defaults>
</compile_context>

<pallas_src>
import functools

import jax
import jax.numpy as jnp
from jax.experimental import pallas as pl
from jax.experimental.pallas import tpu as pltpu

OUT_PAD = 8     # lane-padded output width (true output width is 3); keeps writeback dense & tiny
BN_EPS = 1e-5


def regressor_kernel(wide_ref, deep_ref, rec_ref,
                     wfw_ref, wfd_ref, wfr_ref,
                     b1_ref, w2_ref, b2_ref, out_ref):
    # wide_ref: (TB, Dw)   deep_ref: (TB, Dd)   rec_ref: (TB, Dr)
    # wfw/wfd/wfr: row-blocks of the fused (BN-folded) first-layer weight
    # b1_ref: (1, H)  BN-folded bias
    # w2_ref: (H, OUT_PAD), b2_ref: (1, OUT_PAD) zero-padded output layer
    # out_ref: (TB, OUT_PAD)
    h = jnp.dot(wide_ref[...], wfw_ref[...], preferred_element_type=jnp.float32)
    h = h + jnp.dot(deep_ref[...], wfd_ref[...], preferred_element_type=jnp.float32)
    h = h + jnp.dot(rec_ref[...], wfr_ref[...], preferred_element_type=jnp.float32)
    h = h + b1_ref[...]
    h = jnp.maximum(h, 0.0)
    out_ref[...] = (
        jnp.dot(h, w2_ref[...], preferred_element_type=jnp.float32) + b2_ref[...]
    )


def fold_params(params):
    """Host-side algebraic folding (call once, reuse across forward calls).

    BN (eval mode) is folded into W1/b1; the bias-free wide/deep/recurrent
    projection is folded into W1 as three separate row-blocks so the kernel
    never needs a concatenated input.
    Note: folding is exact in real arithmetic but changes fp32 rounding slightly
    vs the unfolded reference (can matter if running variance is tiny).
    """
    scale = params["gamma"] / jnp.sqrt(params["rvar"] + BN_EPS)           # (1, H)
    w1_f = params["w1"] * scale                                            # (H, H) column-scaled
    b1_f = (params["b1"] - params["rmean"]) * scale + params["beta"]       # (1, H)
    wf_w = params["ww"] @ w1_f                                             # (Dw, H)
    wf_d = params["wd"] @ w1_f                                             # (Dd, H)
    wf_r = params["wr"] @ w1_f                                             # (Dr, H)
    h = params["w1"].shape[1]
    w2_pad = jnp.zeros((h, OUT_PAD), jnp.float32).at[:, :3].set(params["w2"])
    b2_pad = jnp.zeros((1, OUT_PAD), jnp.float32).at[:, :3].set(params["b2"])
    return {
        "wf_w": wf_w, "wf_d": wf_d, "wf_r": wf_r,
        "b1": b1_f, "w2": w2_pad, "b2": b2_pad,
    }


@functools.partial(jax.jit, static_argnames=("block_b",))
def regressor_forward(wide, deep, recurrent, folded, *, block_b=4096):
    """Fused Regressor forward as a single batch-tiled Pallas kernel. Returns (B, 3)."""
    assert block_b % 8 == 0
    wide = wide.astype(jnp.float32)
    deep = deep.astype(jnp.float32)
    recurrent = recurrent.astype(jnp.float32)

    B, Dw = wide.shape
    Dd = deep.shape[1]
    Dr = recurrent.shape[1]
    H = folded["wf_w"].shape[1]
    K = Dw + Dd + Dr

    # Batch tile: full-array block for small batches (always legal), otherwise a
    # multiple-of-8 tile; the ragged last block's writes are clipped by Pallas and
    # rows are independent, so no host-side padding is needed.
    if B <= block_b:
        TB = B
    else:
        TB = block_b
    grid = (pl.cdiv(B, TB),)

    cost = pl.CostEstimate(
        flops=2 * B * (K * H + H * OUT_PAD),
        transcendentals=0,
        bytes_accessed=4 * (B * (K + OUT_PAD) + K * H + H * OUT_PAD + H + OUT_PAD),
    )

    out_padded = pl.pallas_call(
        regressor_kernel,
        out_shape=jax.ShapeDtypeStruct((B, OUT_PAD), jnp.float32),
        grid=grid,
        in_specs=[
            pl.BlockSpec((TB, Dw), lambda i: (i, 0)),        # wide tile, streamed over batch
            pl.BlockSpec((TB, Dd), lambda i: (i, 0)),        # deep tile
            pl.BlockSpec((TB, Dr), lambda i: (i, 0)),        # recurrent tile
            pl.BlockSpec((Dw, H), lambda i: (0, 0)),         # fused weight row-block (wide)
            pl.BlockSpec((Dd, H), lambda i: (0, 0)),         # fused weight row-block (deep)
            pl.BlockSpec((Dr, H), lambda i: (0, 0)),         # fused weight row-block (recurrent)
            pl.BlockSpec((1, H), lambda i: (0, 0)),          # folded bias
            pl.BlockSpec((H, OUT_PAD), lambda i: (0, 0)),    # padded output weight
            pl.BlockSpec((1, OUT_PAD), lambda i: (0, 0)),    # padded output bias
        ],
        out_specs=pl.BlockSpec((TB, OUT_PAD), lambda i: (i, 0)),
        compiler_params=pltpu.CompilerParams(
            dimension_semantics=("parallel",),
        ),
        cost_estimate=cost,
    )(wide, deep, recurrent,
      folded["wf_w"], folded["wf_d"], folded["wf_r"],
      folded["b1"], folded["w2"], folded["b2"])

    return out_padded[:, :3]


def make_params(key, input_dim, output_dim, mid=True):
    """Deterministic synthetic parameters matching Regressor.__init__ shapes.

    nn.Linear weights are stored pre-transposed as (in_dim, out_dim)."""
    ks = jax.random.split(key, 8)
    rec_in = input_dim * 2 if mid else input_dim

    def lin(k, fan_in, fan_out):
        bound = 1.0 / jnp.sqrt(fan_in)
        return jax.random.uniform(k, (fan_in, fan_out), jnp.float32, -bound, bound)

    return {
        "ww": lin(ks[0], input_dim, output_dim),
        "wd": lin(ks[1], input_dim, output_dim),
        "wr": lin(ks[2], rec_in, output_dim),
        # MLP layer 1: Linear(output_dim -> output_dim) with bias
        "w1": lin(ks[3], output_dim, output_dim),
        "b1": jax.random.uniform(ks[4], (1, output_dim), jnp.float32, -0.1, 0.1),
        # BatchNorm1d(output_dim) eval-mode stats/affine (non-trivial values)
        "gamma": jax.random.uniform(ks[7], (1, output_dim), jnp.float32, 0.5, 1.5),
        "beta": jax.random.uniform(ks[5], (1, output_dim), jnp.float32, -0.1, 0.1) * 0.0 + 0.05,
        "rmean": jax.random.uniform(ks[5], (1, output_dim), jnp.float32, -0.2, 0.2),
        "rvar": jax.random.uniform(ks[6], (1, output_dim), jnp.float32, 0.5, 1.5),
        # MLP output layer: Linear(output_dim -> 3) with bias
        "w2": lin(ks[5], output_dim, 3),
        "b2": jax.random.uniform(ks[6], (1, 3), jnp.float32, -0.1, 0.1),
    }


def reference_forward(wide, deep, recurrent, p):
    """Plain-JAX reference of the original (unfolded) forward, for verification."""
    fuse = wide @ p["ww"] + deep @ p["wd"] + recurrent @ p["wr"]
    h = fuse @ p["w1"] + p["b1"]
    h = (h - p["rmean"]) / jnp.sqrt(p["rvar"] + BN_EPS) * p["gamma"] + p["beta"]
    h = jnp.maximum(h, 0.0)
    return h @ p["w2"] + p["b2"]


if __name__ == "__main__":
    key = jax.random.PRNGKey(0)
    k_in, k_p = jax.random.split(key)

    B, input_dim, output_dim = 8, 32, 32   # mid=True -> recurrent has 2*input_dim features
    kw, kd, kr = jax.random.split(k_in, 3)
    wide = jax.random.normal(kw, (B, input_dim), jnp.float32)
    deep = jax.random.normal(kd, (B, input_dim), jnp.float32)
    recurrent = jax.random.normal(kr, (B, 2 * input_dim), jnp.float32)

    params = make_params(k_p, input_dim, output_dim, mid=True)

    # Fold BN + fusion-stage into the kernel weights once (reused across calls).
    folded = jax.tree_util.tree_map(jax.block_until_ready, fold_params(params))

    out = regressor_forward(wide, deep, recurrent, folded)
    out = jax.block_until_ready(out)

    ref = reference_forward(wide, deep, recurrent, params)
    assert out.shape == (B, 3), out.shape
    assert jnp.allclose(out, ref, atol=5e-4, rtol=5e-4), float(jnp.max(jnp.abs(out - ref)))

    print("KERNEL_OK")
</pallas_src>

<mosaic_0001>
module attributes {stable_mosaic.version = 11 : i64} {
  func.func @regressor_kernel(%arg0: i32, %arg1: memref<8x32xf32, #tpu.memory_space<vmem>>, %arg2: memref<8x32xf32, #tpu.memory_space<vmem>>, %arg3: memref<8x64xf32, #tpu.memory_space<vmem>>, %arg4: memref<32x32xf32, #tpu.memory_space<vmem>>, %arg5: memref<32x32xf32, #tpu.memory_space<vmem>>, %arg6: memref<64x32xf32, #tpu.memory_space<vmem>>, %arg7: memref<1x32xf32, #tpu.memory_space<vmem>>, %arg8: memref<32x8xf32, #tpu.memory_space<vmem>>, %arg9: memref<1x8xf32, #tpu.memory_space<vmem>>, %arg10: memref<8x8xf32, #tpu.memory_space<vmem>>) attributes {dimension_semantics = [#tpu.dimension_semantics<parallel>], iteration_bounds = array<i64: 1>, scalar_prefetch = 0 : i64, scratch_operands = 0 : i64, tpu.core_type = #tpu.core_type<tc>, window_params = [{transform_indices = @transform_0, window_bounds = array<i64: 8, 32>}, {transform_indices = @transform_1, window_bounds = array<i64: 8, 32>}, {transform_indices = @transform_2, window_bounds = array<i64: 8, 64>}, {pipeline_mode = #tpu.pipeline_mode<synchronous>, transform_indices = @transform_3, window_bounds = array<i64: 32, 32>}, {pipeline_mode = #tpu.pipeline_mode<synchronous>, transform_indices = @transform_4, window_bounds = array<i64: 32, 32>}, {pipeline_mode = #tpu.pipeline_mode<synchronous>, transform_indices = @transform_5, window_bounds = array<i64: 64, 32>}, {pipeline_mode = #tpu.pipeline_mode<synchronous>, transform_indices = @transform_6, window_bounds = array<i64: 1, 32>}, {pipeline_mode = #tpu.pipeline_mode<synchronous>, transform_indices = @transform_7, window_bounds = array<i64: 32, 8>}, {pipeline_mode = #tpu.pipeline_mode<synchronous>, transform_indices = @transform_8, window_bounds = array<i64: 1, 8>}, {transform_indices = @transform_9, window_bounds = array<i64: 8, 8>}]} {
    %c0 = arith.constant 0 : index
    %c0_0 = arith.constant 0 : index
    %0 = vector.load %arg1[%c0, %c0_0] : memref<8x32xf32, #tpu.memory_space<vmem>>, vector<8x32xf32>
    %c0_1 = arith.constant 0 : index
    %c0_2 = arith.constant 0 : index
    %1 = vector.load %arg4[%c0_1, %c0_2] : memref<32x32xf32, #tpu.memory_space<vmem>>, vector<32x32xf32>
    %cst = arith.constant dense<0.000000e+00> : vector<8x32xf32>
    %2 = tpu.matmul %0, %1, %cst {dimension_numbers = #tpu.dot_dimension_numbers<[1], [0], [0], [1], [0, 0, 1, 1], [], []>} : vector<8x32xf32>, vector<32x32xf32>, vector<8x32xf32> -> vector<8x32xf32>
    %c0_3 = arith.constant 0 : index
    %c0_4 = arith.constant 0 : index
    %3 = vector.load %arg2[%c0_3, %c0_4] : memref<8x32xf32, #tpu.memory_space<vmem>>, vector<8x32xf32>
    %c0_5 = arith.constant 0 : index
    %c0_6 = arith.constant 0 : index
    %4 = vector.load %arg5[%c0_5, %c0_6] : memref<32x32xf32, #tpu.memory_space<vmem>>, vector<32x32xf32>
    %cst_7 = arith.constant dense<0.000000e+00> : vector<8x32xf32>
    %5 = tpu.matmul %3, %4, %cst_7 {dimension_numbers = #tpu.dot_dimension_numbers<[1], [0], [0], [1], [0, 0, 1, 1], [], []>} : vector<8x32xf32>, vector<32x32xf32>, vector<8x32xf32> -> vector<8x32xf32>
    %6 = arith.addf %2, %5 : vector<8x32xf32>
    %c0_8 = arith.constant 0 : index
    %c0_9 = arith.constant 0 : index
    %7 = vector.load %arg3[%c0_8, %c0_9] : memref<8x64xf32, #tpu.memory_space<vmem>>, vector<8x64xf32>
    %c0_10 = arith.constant 0 : index
    %c0_11 = arith.constant 0 : index
    %8 = vector.load %arg6[%c0_10, %c0_11] : memref<64x32xf32, #tpu.memory_space<vmem>>, vector<64x32xf32>
    %cst_12 = arith.constant dense<0.000000e+00> : vector<8x32xf32>
    %9 = tpu.matmul %7, %8, %cst_12 {dimension_numbers = #tpu.dot_dimension_numbers<[1], [0], [0], [1], [0, 0, 1, 1], [], []>} : vector<8x64xf32>, vector<64x32xf32>, vector<8x32xf32> -> vector<8x32xf32>
    %10 = arith.addf %6, %9 : vector<8x32xf32>
    %c0_13 = arith.constant 0 : index
    %c0_14 = arith.constant 0 : index
    %11 = vector.load %arg7[%c0_13, %c0_14] : memref<1x32xf32, #tpu.memory_space<vmem>>, vector<1x32xf32>
    %12 = vector.broadcast %11 : vector<1x32xf32> to vector<8x32xf32>
    %13 = arith.addf %10, %12 : vector<8x32xf32>
    %cst_15 = arith.constant 0.000000e+00 : f32
    %14 = vector.broadcast %cst_15 : f32 to vector<8x32xf32>
    %15 = arith.maximumf %13, %14 : vector<8x32xf32>
    %c0_16 = arith.constant 0 : index
    %c0_17 = arith.constant 0 : index
    %16 = vector.load %arg8[%c0_16, %c0_17] : memref<32x8xf32, #tpu.memory_space<vmem>>, vector<32x8xf32>
    %cst_18 = arith.constant dense<0.000000e+00> : vector<8x8xf32>
    %17 = tpu.matmul %15, %16, %cst_18 {dimension_numbers = #tpu.dot_dimension_numbers<[1], [0], [0], [1], [0, 0, 1, 1], [], []>} : vector<8x32xf32>, vector<32x8xf32>, vector<8x8xf32> -> vector<8x8xf32>
    %c0_19 = arith.constant 0 : index
    %c0_20 = arith.constant 0 : index
    %18 = vector.load %arg9[%c0_19, %c0_20] : memref<1x8xf32, #tpu.memory_space<vmem>>, vector<1x8xf32>
    %19 = vector.broadcast %18 : vector<1x8xf32> to vector<8x8xf32>
    %20 = arith.addf %17, %19 : vector<8x8xf32>
    %c0_21 = arith.constant 0 : index
    %c0_22 = arith.constant 0 : index
    %21 = vector.load %arg10[%c0_21, %c0_22] : memref<8x8xf32, #tpu.memory_space<vmem>>, vector<8x8xf32>
    tpu.vector_store %arg10[%c0_21, %c0_22], %20 {strides = array<i32>} : memref<8x8xf32, #tpu.memory_space<vmem>>, vector<8x8xf32>,
    return
  }
  func.func @transform_0(%arg0: i32) -> (i32, i32) {
    %c0_i32 = arith.constant 0 : i32
    %c0_i32_0 = arith.constant 0 : i32
    return %arg0, %c0_i32 : i32, i32
  }
  func.func @transform_1(%arg0: i32) -> (i32, i32) {
    %c0_i32 = arith.constant 0 : i32
    %c0_i32_0 = arith.constant 0 : i32
    return %arg0, %c0_i32 : i32, i32
  }
  func.func @transform_2(%arg0: i32) -> (i32, i32) {
    %c0_i32 = arith.constant 0 : i32
    %c0_i32_0 = arith.constant 0 : i32
    return %arg0, %c0_i32 : i32, i32
  }
  func.func @transform_3(%arg0: i32) -> (i32, i32) {
    %c0_i32 = arith.constant 0 : i32
    %c0_i32_0 = arith.constant 0 : i32
    %c0_i32_1 = arith.constant 0 : i32
    return %c0_i32, %c0_i32_0 : i32, i32
  }
  func.func @transform_4(%arg0: i32) -> (i32, i32) {
    %c0_i32 = arith.constant 0 : i32
    %c0_i32_0 = arith.constant 0 : i32
    %c0_i32_1 = arith.constant 0 : i32
    return %c0_i32, %c0_i32_0 : i32, i32
  }
  func.func @transform_5(%arg0: i32) -> (i32, i32) {
    %c0_i32 = arith.constant 0 : i32
    %c0_i32_0 = arith.constant 0 : i32
    %c0_i32_1 = arith.constant 0 : i32
    return %c0_i32, %c0_i32_0 : i32, i32
  }
  func.func @transform_6(%arg0: i32) -> (i32, i32) {
    %c0_i32 = arith.constant 0 : i32
    %c0_i32_0 = arith.constant 0 : i32
    %c0_i32_1 = arith.constant 0 : i32
    return %c0_i32, %c0_i32_0 : i32, i32
  }
  func.func @transform_7(%arg0: i32) -> (i32, i32) {
    %c0_i32 = arith.constant 0 : i32
    %c0_i32_0 = arith.constant 0 : i32
    %c0_i32_1 = arith.constant 0 : i32
    return %c0_i32, %c0_i32_0 : i32, i32
  }
  func.func @transform_8(%arg0: i32) -> (i32, i32) {
    %c0_i32 = arith.constant 0 : i32
    %c0_i32_0 = arith.constant 0 : i32
    %c0_i32_1 = arith.constant 0 : i32
    return %c0_i32, %c0_i32_0 : i32, i32
  }
  func.func @transform_9(%arg0: i32) -> (i32, i32) {
    %c0_i32 = arith.constant 0 : i32
    %c0_i32_0 = arith.constant 0 : i32
    return %arg0, %c0_i32 : i32, i32
  }
}

</mosaic_0001>

<bundles_post_ra>
// kernel: regressor_forward.1
= control target key start
LH: loop header
LB: loop body
LE: loop exit
PB: predicated region body
PF: predicated region fallthrough
CT: control target
= control target key end

     0   :  { %v456_v0 = vmov 0.0   ;;  %vm42_vm0 = vcmask 261120   ;;  %vm457_vm1 = vmmov 0   ;;  %vm198_vm2 = vcmask 523264   ;;  %s617_s4 = inlined_call_operand.vmem [shape: f32[32,32], index: 4, kind: input, shape index: {}]   ;;  %s618_s3 = inlined_call_operand.vmem [shape: f32[32,32], index: 3, kind: input, shape index: {}]   ;;  %s619_s1 = inlined_call_operand.vmem [shape: f32[8,32], index: 1, kind: input, shape index: {}]   ;;  %s620_s0 = inlined_call_operand.vmem [shape: f32[8,32], index: 0, kind: input, shape index: {}]   ;;  %s621_s5 = inlined_call_operand.vmem [shape: f32[64,32], index: 5, kind: input, shape index: {}]   ;;  %s622_s2 = inlined_call_operand.vmem [shape: f32[8,64], index: 2, kind: input, shape index: {}]   ;;  %s623_s7 = inlined_call_operand.vmem [shape: f32[32,8], index: 7, kind: input, shape index: {}]   ;;  %s624_s6 = inlined_call_operand.vmem [shape: f32[1,32], index: 6, kind: input, shape index: {}]   ;;  %s625_s8 = inlined_call_operand.vmem [shape: f32[1,8], index: 8, kind: input, shape index: {}]   ;;  %s626_s9 = inlined_call_operand.vmem [shape: f32[8,8], index: 9, kind: output, shape index: {}]  }
   0x1   :  { %402 = vmatprep.subr.mxu0 %v456_v0  ;;  %v41_v1 = vld [vmem:[%s617_s4 + $0x18] sm:$0xff]  ;;  %413 = vmatprep.subr.mxu1 %v456_v0  ;;  %v40_v3 = vld [vmem:[%s617_s4 + $0x10] sm:$0xff]  ;;  %v39_v5 = vld [vmem:[%s617_s4 + $0x8] sm:$0xff]  ;;  %vm366_vm3 = vcmask 64512  }
   0x2   :  { %v36_v2 = vld [vmem:[%s618_s3 + $0x18] sm:$0xff]  ;;  %403 = vmatpush3.msra.mxu0 %v41_v1  ;;  %v35_v4 = vld [vmem:[%s618_s3 + $0x10] sm:$0xff]  ;;  %v34_v6 = vld [vmem:[%s618_s3 + $0x8] sm:$0xff]  ;;  %410 = vmatprep.mubr.msk.f32.mxu0 %vm457_vm1, %v456_v0 }
   0x3   :  { %414 = vmatpush3.msra.mxu1 %v36_v2  ;;  %404 = vmatprep.subr.mxu0 %v456_v0  ;;  %v38_v7 = vld [vmem:[%s617_s4] sm:$0xff]  ;;  %v197_v11 = vld [vmem:[%s621_s5 + $0x38] sm:$0xff]  ;;  %v196_v12 = vld [vmem:[%s621_s5 + $0x30] sm:$0xff] }
   0x4   :  { %415 = vmatprep.subr.mxu1 %v456_v0  ;;  %405 = vmatpush3.msra.mxu0 %v40_v3  ;;  %v37_v8 = vld [vmem:[%s619_s1] sm:$0xff]  ;;  %v195_v13 = vld [vmem:[%s621_s5 + $0x28] sm:$0xff]  ;;  %v193_v15 = vld [vmem:[%s621_s5 + $0x18] sm:$0xff] }
   0x5   :  { %416 = vmatpush3.msra.mxu1 %v35_v4  ;;  %406 = vmatprep.subr.mxu0 %v456_v0  ;;  %v33_v9 = vld [vmem:[%s618_s3] sm:$0xff]  ;;  %v192_v16 = vld [vmem:[%s621_s5 + $0x10] sm:$0xff]  ;;  %v191_v17 = vld [vmem:[%s621_s5 + $0x8] sm:$0xff] }
   0x6   :  { %417 = vmatprep.subr.mxu1 %v456_v0  ;;  %407 = vmatpush3.msra.mxu0 %v39_v5  ;;  %v32_v10 = vld [vmem:[%s620_s0] sm:$0xff]  ;;  %v285_v20 = vld [vmem:[%s623_s7 + $0x18] sm:$0xff]  ;;  %v284_v21 = vld [vmem:[%s623_s7 + $0x10] sm:$0xff] }
   0x7   :  { %418 = vmatpush3.msra.mxu1 %v34_v6  ;;  %408 = vmatprep.subr.mxu0 %v456_v0  ;;  %v194_v14 = vld [vmem:[%s621_s5 + $0x20] sm:$0xff]  ;;  %v283_v22 = vld [vmem:[%s623_s7 + $0x8] sm:$0xff] }
   0x8   :  { %409 = vmatpush3.msra.mxu0 %v38_v7  ;;  %419 = vmatprep.subr.mxu1 %v456_v0  ;;  %v190_v18 = vld [vmem:[%s621_s5] sm:$0xff] }
   0x9   :  { %411 = vmatmul.mubr.msk.f32.vlgmr.msra.gmra.mxu0 %vm42_vm0, %v37_v8  ;;  %420 = vmatpush3.msra.mxu1 %v33_v9  ;;  %v189_v19 = vld [vmem:[%s622_s2] sm:$0xff] }
   0xa   :  { %421 = vmatprep.mubr.msk.f32.mxu1 %vm457_vm1, %v456_v0  ;;  %424 = vmatprep.subr.mxu0 %v456_v0  ;;  %v282_v23 = vld [vmem:[%s623_s7] sm:$0xff] }
   0xb   :  { %422 = vmatmul.mubr.msk.f32.vlgmr.msra.gmra.mxu1 %vm42_vm0, %v32_v10  ;;  %425 = vmatpush3.msra.mxu0 %v197_v11  ;;  %v375_v30 = vld [vmem:[%s624_s6] ss:$0 sm:$0xff] }
   0xc   :  { %426 = vmatprep.subr.mxu0 %v456_v0  ;;  %440 = vmatprep.mubr.msk.f32.mxu0 %vm457_vm1, %v456_v0  ;;  %v376_v35 = vld [vmem:[%s625_s8] ss:$0 sm:$0xff] }
   0xd   :  { %427 = vmatpush3.msra.mxu0 %v196_v12  ;;  %443 = vmatprep.subr.mxu1 %v456_v0 }
   0xe   :  { %428 = vmatprep.subr.mxu0 %v456_v0  ;;  %451 = vmatprep.mubr.msk.f32.mxu1 %vm457_vm1, %v456_v0 }
   0xf   :  { %429 = vmatpush3.msra.mxu0 %v195_v13  ;;  %444 = vmatpush3.msra.mxu1 %v285_v20 }
  0x10   :  { %430 = vmatprep.subr.mxu0 %v456_v0  ;;  %445 = vmatprep.subr.mxu1 %v456_v0 }
  0x11   :  { %431 = vmatpush3.msra.mxu0 %v194_v14  ;;  %446 = vmatpush3.msra.mxu1 %v284_v21 }
  0x12   :  { %432 = vmatprep.subr.mxu0 %v456_v0  ;;  %447 = vmatprep.subr.mxu1 %v456_v0 }
  0x13   :  { %433 = vmatpush3.msra.mxu0 %v193_v15  ;;  %448 = vmatpush3.msra.mxu1 %v283_v22 }
  0x14   :  { %434 = vmatprep.subr.mxu0 %v456_v0  ;;  %449 = vmatprep.subr.mxu1 %v456_v0 }
  0x15   :  { %435 = vmatpush3.msra.mxu0 %v192_v16  ;;  %450 = vmatpush3.msra.mxu1 %v282_v23 }
  0x16   :  { %436 = vmatprep.subr.mxu0 %v456_v0 }
  0x17   :  { %437 = vmatpush3.msra.mxu0 %v191_v17 }
  0x18   :  { %438 = vmatprep.subr.mxu0 %v456_v0 }
  0x19   :  { %439 = vmatpush3.msra.mxu0 %v190_v18 }
  0x1a   :  { %441 = vmatmul.mubr.msk.f32.vlgmr.msra.gmra.mxu0 %vm198_vm2, %v189_v19 }
  0xc9   :  { %v112_v24 = vpop.f32.mrf.mxu0 }
  0xcb   :  { %v185_v25 = vpop.f32.mrf.mxu1  ;;  %v412_v26 = vpop.f32.mrf.mxu0 }
  0xcc   :  { %v186_v28 = vadd.f32 %v185_v25, %v112_v24 }
  0xcd   :  { %v423_v27 = vpop.f32.mrf.mxu1 }
  0xda   :  { %v268_v29 = vpop.f32.mrf.mxu0 }
  0xdb   :  { %v272_v31 = vadd.f32 %v268_v29, %v186_v28 }
  0xdc   :  { %v442_v32 = vpop.f32.mrf.mxu0 }
  0xdd   :  { %v280_v33 = vadd.f32 %v375_v30, %v272_v31 }
  0xdf   :  { %v281_v34 = vmax.f32 %v280_v33, 0.0 }
  0xe1   :  { %452 = vmatmul.mubr.msk.f32.vlgmr.msra.gmra.mxu1 %vm42_vm0, %v281_v34 }
 0x1a1   :  { %v362_v36 = vpop.f32.mrf.mxu1 }
 0x1a2   :  { %v363_v37 = vadd.f32 %v376_v35, %v362_v36 }
 0x1a3   :  { %v453_v38 = vpop.f32.mrf.mxu1 }
 0x1a4   :  { %367 = vst.msk [vmem:[%s626_s9] sm:$0xff] %vm366_vm3, %v363_v37 }

</bundles_post_ra>
